<compile_context>
chip_gen: v6e
topology: v6e:2x2x1
jax: 0.10.0
libtpu: 0.0.40
codegen_flags: <defaults>
</compile_context>

<pallas_src>
import jax
import jax.numpy as jnp
from jax import lax
from jax.experimental import pallas as pl
from jax.experimental.pallas import tpu as pltpu

LANES = 128
SUBLANES = 8
CHUNK_ROWS = 512          # rows per in-kernel accumulation chunk (256 KiB f32)


def _round_up(x: int, m: int) -> int:
    return ((x + m - 1) // m) * m


def _pick_tile_rows() -> int:
    """Row-tile cap per TPU generation (fits default scoped VMEM, double-buffered)."""
    try:
        kind = jax.devices()[0].device_kind.lower()
    except Exception:  # pragma: no cover - defensive
        kind = ""
    if "v6" in kind or "v7" in kind:
        return 8192    # 4 MiB/input block -> 16 MiB double-buffered (<32 MiB scoped)
    return 4096        # 2 MiB/input block ->  8 MiB double-buffered (<16 MiB on v5e)


def _make_kernel(t_rows: int, chunk_rows: int, tiles_per_shard: int,
                 valid_rows: int, needs_mask: bool):
    """Build the streaming masked-SSE kernel for static tile geometry."""
    n_chunks = t_rows // chunk_rows

    def kernel(gt_ref, pred_ref, out_ref):
        # out_ref: (8,128) f32 partial accumulator, resident across the inner
        # (reduction) grid axis because its block index depends only on axis 0.
        @pl.when(pl.program_id(1) == 0)
        def _init():
            out_ref[...] = jnp.zeros_like(out_ref)

        if needs_mask:
            # Global row offset of this tile (UNclamped on purpose: any block the
            # index_map had to clamp contributes zero through the row mask).
            tile_row0 = (pl.program_id(0) * tiles_per_shard
                         + pl.program_id(1)) * t_rows

        def chunk_body(n, acc):
            r0 = pl.multiple_of(n * chunk_rows, chunk_rows)
            g = gt_ref[pl.ds(r0, chunk_rows), :].astype(jnp.float32)
            p = pred_ref[pl.ds(r0, chunk_rows), :].astype(jnp.float32)
            # Single vselect instead of cmp + cast + mul (mask^2 == mask).
            d = jnp.where(g > 0, g - p, jnp.float32(0.0))
            s = d * d
            if needs_mask:
                rid = (tile_row0 + r0
                       + lax.broadcasted_iota(jnp.int32, (chunk_rows, 1), 0))
                s = jnp.where(rid < valid_rows, s, jnp.float32(0.0))
            # (chunk,128) -> (chunk/8,8,128) groups whole vregs; the reduce over
            # axis 0 is pure VPU adds (no cross-lane XLU work in the hot loop).
            return acc + jnp.sum(s.reshape(-1, SUBLANES, LANES), axis=0)

        acc = lax.fori_loop(0, n_chunks, chunk_body,
                            jnp.zeros((SUBLANES, LANES), jnp.float32),
                            unroll=True)
        out_ref[...] += acc

    return kernel


def valid_loss(gt: jax.Array, pred: jax.Array, tile_rows: int | None = None) -> jax.Array:
    """Masked MSE loss: mean(where(gt>0, gt-pred, 0)**2) over ALL elements."""
    assert gt.shape == pred.shape, (gt.shape, pred.shape)
    n_elems = gt.size

    gt_flat = gt.reshape(-1)
    pred_flat = pred.reshape(-1)

    rows = n_elems // LANES                       # full 128-lane rows
    itemsize = min(jnp.dtype(gt.dtype).itemsize, jnp.dtype(pred.dtype).itemsize)
    row_align = SUBLANES * max(1, 4 // max(itemsize, 1))   # f32:8, bf16:16, int8:32

    tile_cap = tile_rows if tile_rows is not None else _pick_tile_rows()
    tile_cap = max(CHUNK_ROWS, _round_up(tile_cap, max(CHUNK_ROWS, row_align)))

    total = jnp.float32(0.0)
    rows_kernel = 0

    if rows > 0:
        if rows <= CHUNK_ROWS:
            # Tiny input: one sublane-aligned tile; the (<row_align)-row
            # remainder joins the scalar tail below (few KiB at most).
            rows_kernel = (rows // row_align) * row_align
            t_rows = rows_kernel
            chunk = rows_kernel
        else:
            # Everything with full 128-lane rows goes through the kernel; the
            # ragged last tile is masked in-kernel (no wrapper slice/pad copy).
            rows_kernel = rows
            n_target = pl.cdiv(rows, tile_cap)
            if n_target > 1 and n_target % 2 == 1:
                n_target += 1          # aim for an even tile count (clean 2-way shard)
            t_rows = min(tile_cap, _round_up(pl.cdiv(rows, n_target), CHUNK_ROWS))
            t_rows = min(t_rows, (rows // CHUNK_ROWS) * CHUNK_ROWS)  # block <= array rows
            chunk = CHUNK_ROWS

    if rows_kernel > 0:
        n_tiles = pl.cdiv(rows_kernel, t_rows)
        shards = 2 if (n_tiles >= 2 and n_tiles % 2 == 0) else 1
        tiles_per_shard = n_tiles // shards
        needs_mask = shards * tiles_per_shard * t_rows > rows_kernel

        bulk = rows_kernel * LANES
        # Pure bitcast when bulk == n_elems (any size that is a multiple of 128).
        gt2d = gt_flat[:bulk].reshape(rows_kernel, LANES)
        pred2d = pred_flat[:bulk].reshape(rows_kernel, LANES)

        last_tile = n_tiles - 1
        in_map = lambda c, i: (jnp.minimum(c * tiles_per_shard + i, last_tile), 0)

        kernel = _make_kernel(t_rows, chunk, tiles_per_shard, rows_kernel, needs_mask)

        partials = pl.pallas_call(
            kernel,
            out_shape=jax.ShapeDtypeStruct((shards, SUBLANES, LANES), jnp.float32),
            grid_spec=pltpu.PrefetchScalarGridSpec(
                num_scalar_prefetch=0,
                grid=(shards, tiles_per_shard),
                in_specs=[
                    pl.BlockSpec((t_rows, LANES), in_map),
                    pl.BlockSpec((t_rows, LANES), in_map),
                ],
                # Lane-dense (8,128) partial per shard; leading dim squeezed.
                out_specs=pl.BlockSpec((None, SUBLANES, LANES),
                                       lambda c, i: (c, 0, 0)),
            ),
            compiler_params=pltpu.CompilerParams(
                dimension_semantics=("parallel", "arbitrary")),
        )(gt2d, pred2d)

        total = total + jnp.sum(partials)

    # Remainder (< row_align rows + sub-128 tail) handled in plain JAX — tiny.
    bulk_elems = rows_kernel * LANES
    if bulk_elems < n_elems:
        g = gt_flat[bulk_elems:].astype(jnp.float32)
        p = pred_flat[bulk_elems:].astype(jnp.float32)
        d = jnp.where(g > 0, g - p, jnp.float32(0.0))
        total = total + jnp.sum(d * d)

    # Mean over the ORIGINAL number of elements (MSELoss default 'mean').
    return (total / jnp.float32(n_elems)).astype(jnp.float32)


def _reference(gt, pred):
    mask = (gt > 0).astype(jnp.float32)
    return jnp.mean((mask * gt.astype(jnp.float32) - mask * pred.astype(jnp.float32)) ** 2)


if __name__ == "__main__":
    key = jax.random.PRNGKey(0)

    # Primary check: NCHW image-style shape consistent with the loss module.
    k0, k1, k2, k3 = jax.random.split(key, 4)
    gt = jax.random.normal(k0, (2, 4, 16, 16), dtype=jnp.float32)
    pred = jax.random.normal(k1, (2, 4, 16, 16), dtype=jnp.float32)
    loss = valid_loss(gt, pred)
    jax.block_until_ready(loss)
    ref = _reference(gt, pred)
    assert jnp.allclose(loss, ref, rtol=1e-5, atol=1e-6), (loss, ref)

    # Secondary check: non-128-aligned element count (kernel bulk + JAX tail).
    gt2 = jax.random.normal(k2, (2, 3, 16, 17), dtype=jnp.float32)
    pred2 = jax.random.normal(k3, (2, 3, 16, 17), dtype=jnp.float32)
    loss2 = valid_loss(gt2, pred2)
    jax.block_until_ready(loss2)
    ref2 = _reference(gt2, pred2)
    assert jnp.allclose(loss2, ref2, rtol=1e-5, atol=1e-6), (loss2, ref2)

    print("KERNEL_OK")
</pallas_src>

<mosaic_0001>
module attributes {stable_mosaic.version = 11 : i64} {
  func.func @kernel(%arg0: i32, %arg1: i32, %arg2: memref<16x128xf32, #tpu.memory_space<vmem>>, %arg3: memref<16x128xf32, #tpu.memory_space<vmem>>, %arg4: memref<1x8x128xf32, #tpu.memory_space<vmem>>) attributes {dimension_semantics = [#tpu.dimension_semantics<parallel>, #tpu.dimension_semantics<arbitrary>], iteration_bounds = array<i64: 1, 1>, scalar_prefetch = 0 : i64, scratch_operands = 0 : i64, tpu.core_type = #tpu.core_type<tc>, window_params = [{transform_indices = @transform_0, window_bounds = array<i64: 16, 128>}, {transform_indices = @transform_1, window_bounds = array<i64: 16, 128>}, {transform_indices = @transform_2, window_bounds = array<i64: 1, 8, 128>}]} {
    %c0_i32 = arith.constant 0 : i32
    %0 = arith.cmpi eq, %arg1, %c0_i32 : i32
    %1 = arith.extui %0 : i1 to i32
    %c0_i32_0 = arith.constant 0 : i32
    %2 = arith.cmpi ne, %1, %c0_i32_0 : i32
    scf.if %2 {
      %cst_12 = arith.constant 0.000000e+00 : f32
      %25 = vector.broadcast %cst_12 : f32 to vector<8x128xf32>
      %c0_13 = arith.constant 0 : index
      %c0_14 = arith.constant 0 : index
      %c0_15 = arith.constant 0 : index
      %26 = vector.load %arg4[%c0_13, %c0_14, %c0_15] : memref<1x8x128xf32, #tpu.memory_space<vmem>>, vector<1x8x128xf32>
      %27 = vector.shape_cast %26 : vector<1x8x128xf32> to vector<8x128xf32>
      %28 = vector.shape_cast %25 : vector<8x128xf32> to vector<1x8x128xf32>
      tpu.vector_store %arg4[%c0_13, %c0_14, %c0_15], %28 {strides = array<i32>} : memref<1x8x128xf32, #tpu.memory_space<vmem>>, vector<1x8x128xf32>,
    } else {
    }
    %cst = arith.constant 0.000000e+00 : f32
    %3 = vector.broadcast %cst : f32 to vector<8x128xf32>
    %c0_i32_1 = arith.constant 0 : i32
    %c16_i32 = arith.constant 16 : i32
    %4 = arith.muli %c0_i32_1, %c16_i32 : i32
    %5 = tpu.assume_multiple %4, 16 : i32
    %6 = arith.index_cast %5 : i32 to index
    %c0 = arith.constant 0 : index
    %7 = vector.load %arg2[%6, %c0] : memref<16x128xf32, #tpu.memory_space<vmem>>, vector<16x128xf32>
    %8 = arith.index_cast %5 : i32 to index
    %c0_2 = arith.constant 0 : index
    %9 = vector.load %arg3[%8, %c0_2] : memref<16x128xf32, #tpu.memory_space<vmem>>, vector<16x128xf32>
    %cst_3 = arith.constant 0.000000e+00 : f32
    %10 = vector.broadcast %cst_3 : f32 to vector<16x128xf32>
    %11 = arith.cmpf ogt, %7, %10 : vector<16x128xf32>
    %12 = arith.subf %7, %9 : vector<16x128xf32>
    %cst_4 = arith.constant 0.000000e+00 : f32
    %13 = vector.broadcast %cst_4 : f32 to vector<16x128xf32>
    %14 = arith.select %11, %12, %13 : vector<16x128xi1>, vector<16x128xf32>
    %15 = arith.mulf %14, %14 : vector<16x128xf32>
    %16 = vector.shape_cast %15 : vector<16x128xf32> to vector<2x8x128xf32>
    %cst_5 = arith.constant dense<0.000000e+00> : vector<8x128xf32>
    %17 = vector.multi_reduction <add>, %16, %cst_5 [0] : vector<2x8x128xf32> to vector<8x128xf32>
    %18 = arith.addf %3, %17 : vector<8x128xf32>
    %c1_i32 = arith.constant 1 : i32
    %c0_6 = arith.constant 0 : index
    %c0_7 = arith.constant 0 : index
    %c0_8 = arith.constant 0 : index
    %19 = vector.load %arg4[%c0_6, %c0_7, %c0_8] : memref<1x8x128xf32, #tpu.memory_space<vmem>>, vector<1x8x128xf32>
    %20 = vector.shape_cast %19 : vector<1x8x128xf32> to vector<8x128xf32>
    %21 = arith.addf %20, %18 : vector<8x128xf32>
    %c0_9 = arith.constant 0 : index
    %c0_10 = arith.constant 0 : index
    %c0_11 = arith.constant 0 : index
    %22 = vector.load %arg4[%c0_9, %c0_10, %c0_11] : memref<1x8x128xf32, #tpu.memory_space<vmem>>, vector<1x8x128xf32>
    %23 = vector.shape_cast %22 : vector<1x8x128xf32> to vector<8x128xf32>
    %24 = vector.shape_cast %21 : vector<8x128xf32> to vector<1x8x128xf32>
    tpu.vector_store %arg4[%c0_9, %c0_10, %c0_11], %24 {strides = array<i32>} : memref<1x8x128xf32, #tpu.memory_space<vmem>>, vector<1x8x128xf32>,
    return
  }
  func.func @transform_0(%arg0: i32, %arg1: i32) -> (i32, i32) {
    %c1_i32 = arith.constant 1 : i32
    %0 = arith.muli %arg0, %c1_i32 : i32
    %1 = arith.addi %0, %arg1 : i32
    %c0_i32 = arith.constant 0 : i32
    %2 = arith.minsi %1, %c0_i32 : i32
    %c0_i32_0 = arith.constant 0 : i32
    %c0_i32_1 = arith.constant 0 : i32
    return %2, %c0_i32_0 : i32, i32
  }
  func.func @transform_1(%arg0: i32, %arg1: i32) -> (i32, i32) {
    %c1_i32 = arith.constant 1 : i32
    %0 = arith.muli %arg0, %c1_i32 : i32
    %1 = arith.addi %0, %arg1 : i32
    %c0_i32 = arith.constant 0 : i32
    %2 = arith.minsi %1, %c0_i32 : i32
    %c0_i32_0 = arith.constant 0 : i32
    %c0_i32_1 = arith.constant 0 : i32
    return %2, %c0_i32_0 : i32, i32
  }
  func.func @transform_2(%arg0: i32, %arg1: i32) -> (i32, i32, i32) {
    %c0_i32 = arith.constant 0 : i32
    %c0_i32_0 = arith.constant 0 : i32
    %c0_i32_1 = arith.constant 0 : i32
    return %arg0, %c0_i32, %c0_i32_0 : i32, i32, i32
  }
}

</mosaic_0001>

<bundles_post_ra>
// kernel: tpu_custom_call.1
= control target key start
LH: loop header
LB: loop body
LE: loop exit
PB: predicated region body
PF: predicated region fallthrough
CT: control target
= control target key end

     0   :  { %7 = vsyncpa [#allocation3], 0  ;;  %s203_s0 = inlined_call_operand.hbm [shape: f32[16,128], index: 0, kind: input, shape index: {}]   ;;  %s204_s1 = inlined_call_operand.hbm [shape: f32[16,128], index: 1, kind: input, shape index: {}]   ;;  %s205_s2 = inlined_call_operand.hbm [shape: f32[1,8,128], index: 2, kind: output, shape index: {}]  }
   0x1   :  { %8 = vsyncpa [#allocation6], 0 }
   0x2   :  { %9 = vsyncpa [#allocation4], 0  ;;  %s174_s9 = smov [#allocation2]  }
   0x3   :  { %s21_s10 = sshll.u32 %s174_s9, 4  ;;  %s22_s10 = int_to_ptr.vmem [resolvable:$true] %s21_s10 }
   0x4   :  { %s116_s11 = scalar_lea.vmem %s22_s10, 256  ;;  %p121_p1 = scmp.lt.s32.totalorder %s22_s10, %s22_s10 }
   0x5   :  { %p117_p0 = scmp.ne.s32.totalorder %s22_s10, %s116_s11  ;;  %p122_p2 = scmp.lt.s32.totalorder %s116_s11, %s116_s11 }
   0x7   :  { %p123_p3 = por %p122_p2, %p121_p1 }
   0x9   :  { %p124_p4 = pnand %p123_p3, %p117_p0 }
   0xb   :  { %127 = shalt.err (!%p124_p4)
}
   0xc   :  { %s175_s12 = smov 128   ;;  %s176_s13 = smov 8  }
   0xd   :  { %27 = dma.hbm_to_vmem [thread:$0]  %s203_s0, 256, %s22_s10, [#allocation3], %s175_s12, %s175_s12, %s176_s13  }
   0xe   :  { %s177_s16 = smov [#allocation5]  }
   0xf   :  { %s39_s17 = sshll.u32 %s177_s16, 4  ;;  %s40_s17 = int_to_ptr.vmem [resolvable:$true] %s39_s17 }
  0x10   :  { %s136_s18 = scalar_lea.vmem %s40_s17, 256  ;;  %p141_p6 = scmp.lt.s32.totalorder %s40_s17, %s40_s17 }
  0x11   :  { %p137_p5 = scmp.ne.s32.totalorder %s40_s17, %s136_s18  ;;  %p142_p7 = scmp.lt.s32.totalorder %s136_s18, %s136_s18 }
  0x13   :  { %p143_p8 = por %p142_p7, %p141_p6 }
  0x15   :  { %p144_p9 = pnand %p143_p8, %p137_p5 }
  0x17   :  { %147 = shalt.err (!%p144_p9)
}
  0x18   :  { %45 = dma.hbm_to_vmem [thread:$0]  %s204_s1, 256, %s40_s17, [#allocation6], %s175_s12, %s175_s12, %s176_s13  }
  0x19   :  { %168 = dma.done.wait [#allocation3], 256  }
  0x1a   :  { %169 = vsyncadd [#allocation3], 4294967040 }
  0x1b   :  { %170 = dma.done.wait [#allocation6], 256  }
  0x1c   :  { %171 = vsyncadd [#allocation6], 4294967040  ;;  %v65_v0 = vld [vmem:[#allocation2] sm:$0xff]  ;;  %v66_v1 = vld [vmem:[#allocation2 + $0x8] sm:$0xff]  ;;  %s178_s0 = smov [#allocation7]  }
  0x1d   :  { %v67_v2 = vld [vmem:[#allocation5] sm:$0xff]  ;;  %v68_v3 = vld [vmem:[#allocation5 + $0x8] sm:$0xff]  ;;  %vm69_vm0 = vcmp.gt.f32.partialorder %v65_v0, 0.0  ;;  %vm70_vm1 = vcmp.gt.f32.partialorder %v66_v1, 0.0  ;;  %s88_s21 = sshll.u32 %s178_s0, 4  ;;  %s89_s21 = int_to_ptr.vmem [resolvable:$true] %s88_s21 }
  0x1e   :  { %v71_v4 = vsub.f32 %v65_v0, %v67_v2  ;;  %v72_v5 = vsub.f32 %v66_v1, %v68_v3  ;;  %s148_s1 = scalar_lea.vmem %s89_s21, 128  ;;  %p153_p11 = scmp.lt.s32.totalorder %s89_s21, %s89_s21 }
  0x1f   :  { %p149_p10 = scmp.ne.s32.totalorder %s89_s21, %s148_s1  ;;  %p154_p12 = scmp.lt.s32.totalorder %s148_s1, %s148_s1 }
  0x20   :  { %v73_v6 = vsel %vm69_vm0, %v71_v4, 0.0  ;;  %v74_v7 = vsel %vm70_vm1, %v72_v5, 0.0 }
  0x21   :  { %v75_v8 = vmul.f32 %v73_v6, %v73_v6  ;;  %v76_v9 = vmul.f32 %v74_v7, %v74_v7  ;;  %p155_p13 = por %p154_p12, %p153_p11 }
  0x23   :  { %v77_v10 = vadd.f32 %v76_v9, %v75_v8  ;;  %p156_p0 = pnand %p155_p13, %p149_p10 }
  0x25   :  { %81 = vst [vmem:[#allocation7] sm:$0xff] %v77_v10 }
  0x26   :  { %159 = shalt.err (!%p156_p0)
}
  0x27   :  { %91 = dma.vmem_to_hbm [thread:$0]  %s89_s21, 128, %s205_s2, [#allocation4]  }
  0x28   :  { %172 = dma.done.wait [#allocation4], 128  }
  0x29   :  { %173 = vsyncadd [#allocation4], 4294967168 }
  0x2a   :  { %95 = vsyncpa [#allocation3], 1 }
  0x2b   :  { %96 = vsyncpa [#allocation6], 1 }
  0x2c   :  { %97 = vsyncpa [#allocation4], 1 }

</bundles_post_ra>
